<compile_context>
chip_gen: v5e
topology: v5e:2x2
jax: 0.10.0
libtpu: 0.0.40
codegen_flags: <defaults>
</compile_context>

<pallas_src>
import functools

import jax
import jax.numpy as jnp
from jax.experimental import pallas as pl
from jax.experimental.pallas import tpu as pltpu


def _cdiv(a, b):
    return -(-a // b)


def _round_up(a, b):
    return _cdiv(a, b) * b


def _vmem_capacity_bytes():
    try:
        v = getattr(pltpu.get_tpu_info(), "vmem_capacity_bytes", None)
        if isinstance(v, int) and v > 0:
            return v
    except Exception:
        pass
    return 64 << 20  # conservative default (v7x-sized)


def _num_tensorcores():
    # Best-effort detection; default to 1 (v5e/v6e) so the split never hurts.
    # TODO(synk): on v7x, verify the leading "parallel" axis really lands on
    # both TensorCores (xprof); if not, switch it to pltpu.CORE_PARALLEL.
    try:
        info = pltpu.get_tpu_info()
        for name in ("num_cores", "core_count", "num_tensorcores",
                     "tensorcore_count"):
            v = getattr(info, name, None)
            if isinstance(v, int) and v > 0:
                return v
    except Exception:
        pass
    return 1


def _wce_kernel(pred_ref, gt_ref, out_ref, acc_ref, *,
                w_pos, w_neg, t_bias, t_scale, out_scale,
                use_sigmoid, use_label_smoothing,
                block_rows, sub_rows, num_sub, steps_per_split,
                valid_rows, need_mask):
    s = pl.program_id(0)          # split (parallel axis)
    i = pl.program_id(1)          # step within split (reduction axis)
    cols = acc_ref.shape[-1]

    @pl.when(i == 0)
    def _():
        acc_ref[...] = jnp.zeros_like(acc_ref)

    row0 = (s * steps_per_split + i) * block_rows   # global row of this block

    def accumulate(masked):
        def body(j, carry):
            r0 = pl.multiple_of(j * sub_rows, sub_rows)
            pred = pred_ref[pl.ds(r0, sub_rows), :].astype(jnp.float32)
            gt = gt_ref[pl.ds(r0, sub_rows), :].astype(jnp.float32)

            if use_label_smoothing:
                # gt*(1-a) + (1-gt)*a  ==  a + gt*(1-2a)   (constants in Python)
                target = jnp.float32(t_bias) + gt * jnp.float32(t_scale)
            else:
                target = gt

            # NB: matches the module exactly — pos_weight goes to gt == 0.
            w = jnp.where(gt == 0.0, jnp.float32(w_pos), jnp.float32(w_neg))

            if use_sigmoid:
                # numerically-stable binary_cross_entropy_with_logits
                x = pred
                loss = (jnp.maximum(x, 0.0) - x * target
                        + jnp.log1p(jnp.exp(-jnp.abs(x))))
                wl = w * loss
            else:
                # binary_cross_entropy on probabilities (log clamped at -100).
                # Factored as -(log_1mp + t*(log_p - log_1mp)); the minus sign
                # is folded into w (w_pos/w_neg are negated on this path).
                log_p = jnp.maximum(jnp.log(pred), -100.0)
                log_1mp = jnp.maximum(jnp.log1p(-pred), -100.0)
                wl = w * (log_1mp + target * (log_p - log_1mp))

            if masked:
                ridx = (row0 + r0
                        + jax.lax.broadcasted_iota(jnp.int32, wl.shape, 0))
                wl = jnp.where(ridx < valid_rows, wl, 0.0)

            # Fold the (sub_rows, cols) slab onto the (8, cols) accumulator:
            # pure tile-aligned VPU adds, hidden under the input DMAs.
            acc_ref[...] += wl.reshape(sub_rows // 8, 8, cols).sum(axis=0)
            return carry

        jax.lax.fori_loop(0, num_sub, body, 0, unroll=True)

    if need_mask:
        # Only the tail tile(s) pay for the row-validity mask.
        tail = row0 + block_rows > valid_rows

        @pl.when(jnp.logical_not(tail))
        def _():
            accumulate(False)

        @pl.when(tail)
        def _():
            accumulate(True)
    else:
        accumulate(False)

    @pl.when(i == pl.num_programs(1) - 1)
    def _():
        # single cross-lane reduce + scale, once per split
        out_ref[...] = (jnp.sum(acc_ref[...])
                        * jnp.float32(out_scale)).reshape(1, 1, 1)


def weighted_ce_loss(pred_label, gt_label, *,
                     pos_weight=0.5, neg_weight=1.0, alpha=0.1,
                     loss_weight=1.0, use_sigmoid=False,
                     use_label_smoothing=False,
                     block_rows=None, num_splits=None):
    """Scalar float32 loss matching the PyTorch module's forward."""
    assert pred_label.shape == gt_label.shape
    if gt_label.dtype == jnp.bool_:
        gt_label = gt_label.astype(jnp.int8)

    # Collapse to 2-D (rows, cols); a leading-dim merge is layout-free in XLA.
    if pred_label.ndim == 1:
        pred_label = pred_label.reshape(1, -1)
        gt_label = gt_label.reshape(1, -1)
    elif pred_label.ndim > 2:
        last = pred_label.shape[-1]
        pred_label = pred_label.reshape(-1, last)
        gt_label = gt_label.reshape(-1, last)
    rows, cols = pred_label.shape
    total_elems = rows * cols

    p_item = pred_label.dtype.itemsize
    g_item = gt_label.dtype.itemsize
    # sublane granularity per dtype: f32 -> 8, bf16 -> 16, int8 -> 32
    granule = max(32 // min(p_item, 4), 32 // min(g_item, 4), 8)

    # --- generation-dependent budgets ---
    vmem_cap = _vmem_capacity_bytes()
    big_vmem = vmem_cap >= (100 << 20)          # v5e/v6e (128 MiB) vs v7x (64 MiB)
    target_bytes = (8 << 20) if big_vmem else (4 << 20)   # per f32 input block
    cap_limit = (100 << 20) if big_vmem else (56 << 20)

    if num_splits is None:
        num_splits = _num_tensorcores()
    num_splits = max(1, min(int(num_splits), max(1, rows // granule)))

    def plan(ns):
        rps = _round_up(_cdiv(rows, ns), granule)
        bytes_per_row = cols * (p_item + g_item)
        budget = max(cap_limit - (6 << 20), 2 << 20)
        max_rows_vmem = max(granule,
                            (budget // (2 * bytes_per_row)) // granule * granule)
        if block_rows is not None:
            tgt = max(granule, _round_up(int(block_rows), granule))
        else:
            tgt = max(granule,
                      (target_bytes // (4 * cols)) // granule * granule)
        br = min(tgt, max_rows_vmem, rps)
        sub_pref = _round_up(512, granule)
        sr = min(br, sub_pref)
        nsub = min(max(1, br // sr), 16)
        br = nsub * sr
        steps = _cdiv(rps, br)
        return br, sr, nsub, steps

    br, sr, nsub, steps = plan(num_splits)
    # Guarantee no grid block starts past the last valid row (no fully-OOB DMA).
    if num_splits > 1 and (num_splits * steps - 1) * br >= rows:
        num_splits = 1
        br, sr, nsub, steps = plan(1)

    need_mask = (num_splits * steps * br) != rows

    # Fold constants: label-smoothing affine, BCE sign into the weights.
    t_scale = 1.0 - 2.0 * float(alpha)
    t_bias = float(alpha)
    if use_sigmoid:
        w_pos, w_neg = float(pos_weight), float(neg_weight)
    else:
        w_pos, w_neg = -float(pos_weight), -float(neg_weight)

    kernel = functools.partial(
        _wce_kernel,
        w_pos=w_pos, w_neg=w_neg, t_bias=t_bias, t_scale=t_scale,
        out_scale=float(loss_weight) / float(total_elems),
        use_sigmoid=bool(use_sigmoid),
        use_label_smoothing=bool(use_label_smoothing),
        block_rows=int(br), sub_rows=int(sr), num_sub=int(nsub),
        steps_per_split=int(steps), valid_rows=int(rows),
        need_mask=bool(need_mask))

    # VMEM: 2 double-buffered input blocks + (8, cols) accumulator + headroom.
    # TODO(synk): for extremely wide inputs (cols ~> 1M f32) add a column tile
    # to the grid instead of relying on the row clamp alone.
    per_block = br * cols * (p_item + g_item)
    acc_bytes = 8 * cols * 4
    vmem_limit = 2 * per_block + acc_bytes + (4 << 20)
    vmem_limit = int(min(max(vmem_limit, 32 << 20), cap_limit))

    steps_c = int(steps)  # captured by the index maps

    partials = pl.pallas_call(
        kernel,
        out_shape=jax.ShapeDtypeStruct((num_splits, 1, 1), jnp.float32),
        grid_spec=pltpu.PrefetchScalarGridSpec(
            num_scalar_prefetch=0,
            grid=(num_splits, steps_c),
            in_specs=[
                pl.BlockSpec((br, cols), lambda s, i: (s * steps_c + i, 0)),
                pl.BlockSpec((br, cols), lambda s, i: (s * steps_c + i, 0)),
            ],
            out_specs=pl.BlockSpec((1, 1, 1), lambda s, i: (s, 0, 0)),
            scratch_shapes=[pltpu.VMEM((8, cols), jnp.float32)],
        ),
        compiler_params=pltpu.CompilerParams(
            dimension_semantics=("parallel", "arbitrary"),
            vmem_limit_bytes=vmem_limit),
    )(pred_label, gt_label)

    # trivial XLA add over the (num_splits,) per-core partial sums
    return jnp.sum(partials)


def _reference(pred, gt, *, pos_weight, neg_weight, alpha, loss_weight,
               use_sigmoid, use_label_smoothing):
    pred = pred.astype(jnp.float32)
    gt = gt.astype(jnp.float32)
    target = gt * (1 - alpha) + (1 - gt) * alpha if use_label_smoothing else gt
    w = jnp.where(gt == 0, pos_weight, neg_weight).astype(jnp.float32)
    if use_sigmoid:
        loss = (jnp.maximum(pred, 0) - pred * target
                + jnp.log1p(jnp.exp(-jnp.abs(pred))))
    else:
        loss = -(target * jnp.maximum(jnp.log(pred), -100.0)
                 + (1 - target) * jnp.maximum(jnp.log(1 - pred), -100.0))
    return jnp.mean(w * loss) * loss_weight


if __name__ == "__main__":
    key = jax.random.PRNGKey(0)
    k1, k2, k3, k4 = jax.random.split(key, 4)

    # --- case 1: 4-D probabilities + label smoothing (non-sigmoid path) ---
    shape = (2, 4, 16, 16)
    pred = jax.random.uniform(k1, shape, jnp.float32, minval=0.01, maxval=0.99)
    gt = (jax.random.uniform(k2, shape) > 0.5).astype(jnp.float32)
    cfg = dict(pos_weight=0.5, neg_weight=1.0, alpha=0.1, loss_weight=1.0,
               use_sigmoid=False, use_label_smoothing=True)
    out = jax.block_until_ready(weighted_ce_loss(pred, gt, **cfg))
    ref = _reference(pred, gt, **cfg)
    assert jnp.allclose(out, ref, rtol=2e-5, atol=2e-5), (out, ref)

    # --- case 2: logits path (binary_cross_entropy_with_logits) + smoothing ---
    rows, cols = 64, 256
    logits = jax.random.normal(k1, (rows, cols), jnp.float32) * 2.0
    gt2 = (jax.random.uniform(k2, (rows, cols)) > 0.5).astype(jnp.float32)
    cfg2 = dict(pos_weight=0.5, neg_weight=1.0, alpha=0.1, loss_weight=2.0,
                use_sigmoid=True, use_label_smoothing=True)
    out2 = jax.block_until_ready(weighted_ce_loss(logits, gt2, **cfg2))
    ref2 = _reference(logits, gt2, **cfg2)
    assert jnp.allclose(out2, ref2, rtol=2e-5, atol=2e-5), (out2, ref2)

    # --- case 3: ragged rows + narrow (bf16) storage dtypes -----------------
    rows3, cols3 = 83, 200
    pred3 = jax.random.uniform(k3, (rows3, cols3), jnp.float32,
                               minval=0.01, maxval=0.99).astype(jnp.bfloat16)
    gt3 = (jax.random.uniform(k4, (rows3, cols3)) > 0.3).astype(jnp.bfloat16)
    cfg3 = dict(pos_weight=0.7, neg_weight=1.3, alpha=0.05, loss_weight=0.5,
                use_sigmoid=False, use_label_smoothing=True)
    out3 = jax.block_until_ready(weighted_ce_loss(pred3, gt3, **cfg3))
    ref3 = _reference(pred3, gt3, **cfg3)
    assert jnp.allclose(out3, ref3, rtol=2e-5, atol=2e-5), (out3, ref3)

    # --- case 4: plain BCE, no smoothing, ragged f32 ------------------------
    rows4 = 44
    pred4 = jax.random.uniform(k3, (rows4, cols3), jnp.float32,
                               minval=0.01, maxval=0.99)
    gt4 = (jax.random.uniform(k2, (rows4, cols3)) > 0.5).astype(jnp.float32)
    cfg4 = dict(pos_weight=0.9, neg_weight=1.1, alpha=0.0, loss_weight=1.0,
                use_sigmoid=False, use_label_smoothing=False)
    out4 = jax.block_until_ready(weighted_ce_loss(pred4, gt4, **cfg4))
    ref4 = _reference(pred4, gt4, **cfg4)
    assert jnp.allclose(out4, ref4, rtol=2e-5, atol=2e-5), (out4, ref4)

    print("KERNEL_OK")
</pallas_src>

<mosaic_0001>
module attributes {stable_mosaic.version = 11 : i64} {
  func.func @_wce_kernel(%arg0: i32, %arg1: i32, %arg2: memref<128x16xf32, #tpu.memory_space<vmem>>, %arg3: memref<128x16xf32, #tpu.memory_space<vmem>>, %arg4: memref<1x1x1xf32, #tpu.memory_space<vmem>>, %arg5: memref<8x16xf32, #tpu.memory_space<vmem>>) attributes {dimension_semantics = [#tpu.dimension_semantics<parallel>, #tpu.dimension_semantics<arbitrary>], iteration_bounds = array<i64: 1, 1>, scalar_prefetch = 0 : i64, scratch_operands = 1 : i64, tpu.core_type = #tpu.core_type<tc>, window_params = [{transform_indices = @transform_0, window_bounds = array<i64: 128, 16>}, {transform_indices = @transform_1, window_bounds = array<i64: 128, 16>}, {transform_indices = @transform_2, window_bounds = array<i64: 1, 1, 1>}]} {
    %c0_i32 = arith.constant 0 : i32
    %0 = arith.cmpi eq, %arg1, %c0_i32 : i32
    %1 = arith.extui %0 : i1 to i32
    %c0_i32_0 = arith.constant 0 : i32
    %2 = arith.cmpi ne, %1, %c0_i32_0 : i32
    scf.if %2 {
      %cst_17 = arith.constant 0.000000e+00 : f32
      %38 = vector.broadcast %cst_17 : f32 to vector<8x16xf32>
      %c0_18 = arith.constant 0 : index
      %c0_19 = arith.constant 0 : index
      %39 = vector.load %arg5[%c0_18, %c0_19] : memref<8x16xf32, #tpu.memory_space<vmem>>, vector<8x16xf32>
      tpu.vector_store %arg5[%c0_18, %c0_19], %38 {strides = array<i32>} : memref<8x16xf32, #tpu.memory_space<vmem>>, vector<8x16xf32>,
    } else {
    }
    %c0_i32_1 = arith.constant 0 : i32
    %c128_i32 = arith.constant 128 : i32
    %3 = arith.muli %c0_i32_1, %c128_i32 : i32
    %4 = tpu.assume_multiple %3, 128 : i32
    %5 = arith.index_cast %4 : i32 to index
    %c0 = arith.constant 0 : index
    %6 = vector.load %arg2[%5, %c0] : memref<128x16xf32, #tpu.memory_space<vmem>>, vector<128x16xf32>
    %7 = arith.index_cast %4 : i32 to index
    %c0_2 = arith.constant 0 : index
    %8 = vector.load %arg3[%7, %c0_2] : memref<128x16xf32, #tpu.memory_space<vmem>>, vector<128x16xf32>
    %cst = arith.constant 8.000000e-01 : f32
    %9 = vector.broadcast %cst : f32 to vector<128x16xf32>
    %10 = arith.mulf %8, %9 : vector<128x16xf32>
    %cst_3 = arith.constant 1.000000e-01 : f32
    %11 = vector.broadcast %cst_3 : f32 to vector<128x16xf32>
    %12 = arith.addf %11, %10 : vector<128x16xf32>
    %cst_4 = arith.constant 0.000000e+00 : f32
    %13 = vector.broadcast %cst_4 : f32 to vector<128x16xf32>
    %14 = arith.cmpf oeq, %8, %13 : vector<128x16xf32>
    %cst_5 = arith.constant -5.000000e-01 : f32
    %cst_6 = arith.constant -1.000000e+00 : f32
    %15 = vector.broadcast %cst_5 : f32 to vector<128x16xf32>
    %16 = vector.broadcast %cst_6 : f32 to vector<128x16xf32>
    %17 = arith.select %14, %15, %16 : vector<128x16xi1>, vector<128x16xf32>
    %18 = math.log %6 : vector<128x16xf32>
    %cst_7 = arith.constant -1.000000e+02 : f32
    %19 = vector.broadcast %cst_7 : f32 to vector<128x16xf32>
    %20 = arith.maximumf %18, %19 : vector<128x16xf32>
    %cst_8 = arith.constant 0.000000e+00 : f32
    %21 = vector.broadcast %cst_8 : f32 to vector<128x16xf32>
    %22 = arith.subf %21, %6 : vector<128x16xf32>
    %23 = math.log1p %22 : vector<128x16xf32>
    %cst_9 = arith.constant -1.000000e+02 : f32
    %24 = vector.broadcast %cst_9 : f32 to vector<128x16xf32>
    %25 = arith.maximumf %23, %24 : vector<128x16xf32>
    %26 = arith.subf %20, %25 : vector<128x16xf32>
    %27 = arith.mulf %12, %26 : vector<128x16xf32>
    %28 = arith.addf %25, %27 : vector<128x16xf32>
    %29 = arith.mulf %17, %28 : vector<128x16xf32>
    %c0_10 = arith.constant 0 : index
    %c0_11 = arith.constant 0 : index
    %30 = vector.load %arg5[%c0_10, %c0_11] : memref<8x16xf32, #tpu.memory_space<vmem>>, vector<8x16xf32>
    %31 = vector.shape_cast %29 : vector<128x16xf32> to vector<16x8x16xf32>
    %cst_12 = arith.constant dense<0.000000e+00> : vector<8x16xf32>
    %32 = vector.multi_reduction <add>, %31, %cst_12 [0] : vector<16x8x16xf32> to vector<8x16xf32>
    %33 = arith.addf %30, %32 : vector<8x16xf32>
    %c0_13 = arith.constant 0 : index
    %c0_14 = arith.constant 0 : index
    %34 = vector.load %arg5[%c0_13, %c0_14] : memref<8x16xf32, #tpu.memory_space<vmem>>, vector<8x16xf32>
    tpu.vector_store %arg5[%c0_13, %c0_14], %33 {strides = array<i32>} : memref<8x16xf32, #tpu.memory_space<vmem>>, vector<8x16xf32>,
    %c1_i32 = arith.constant 1 : i32
    %c0_i32_15 = arith.constant 0 : i32
    %35 = arith.cmpi eq, %arg1, %c0_i32_15 : i32
    %36 = arith.extui %35 : i1 to i32
    %c0_i32_16 = arith.constant 0 : i32
    %37 = arith.cmpi ne, %36, %c0_i32_16 : i32
    scf.if %37 {
      %c0_17 = arith.constant 0 : index
      %c0_18 = arith.constant 0 : index
      %38 = vector.load %arg5[%c0_17, %c0_18] : memref<8x16xf32, #tpu.memory_space<vmem>>, vector<8x16xf32>
      %39 = vector.shape_cast %38 : vector<8x16xf32> to vector<1x8x16xf32>
      %cst_19 = arith.constant dense<0.000000e+00> : vector<1xf32>
      %40 = vector.multi_reduction <add>, %39, %cst_19 [1, 2] : vector<1x8x16xf32> to vector<1xf32>
      %41 = vector.shape_cast %40 : vector<1xf32> to vector<1x1x1xf32>
      %42 = vector.extract %41[0, 0, 0] : f32 from vector<1x1x1xf32>
      %cst_20 = arith.constant 4.8828125E-4 : f32
      %43 = arith.mulf %42, %cst_20 : f32
      %44 = vector.broadcast %43 : f32 to vector<1x1x1xf32>
      %c0_21 = arith.constant 0 : index
      %c0_22 = arith.constant 0 : index
      %c0_23 = arith.constant 0 : index
      %45 = vector.load %arg4[%c0_21, %c0_22, %c0_23] : memref<1x1x1xf32, #tpu.memory_space<vmem>>, vector<1x1x1xf32>
      tpu.vector_store %arg4[%c0_21, %c0_22, %c0_23], %44 {strides = array<i32>} : memref<1x1x1xf32, #tpu.memory_space<vmem>>, vector<1x1x1xf32>,
    } else {
    }
    return
  }
  func.func @transform_0(%arg0: i32, %arg1: i32) -> (i32, i32) {
    %c1_i32 = arith.constant 1 : i32
    %0 = arith.muli %arg0, %c1_i32 : i32
    %1 = arith.addi %0, %arg1 : i32
    %c0_i32 = arith.constant 0 : i32
    %c0_i32_0 = arith.constant 0 : i32
    return %1, %c0_i32 : i32, i32
  }
  func.func @transform_1(%arg0: i32, %arg1: i32) -> (i32, i32) {
    %c1_i32 = arith.constant 1 : i32
    %0 = arith.muli %arg0, %c1_i32 : i32
    %1 = arith.addi %0, %arg1 : i32
    %c0_i32 = arith.constant 0 : i32
    %c0_i32_0 = arith.constant 0 : i32
    return %1, %c0_i32 : i32, i32
  }
  func.func @transform_2(%arg0: i32, %arg1: i32) -> (i32, i32, i32) {
    %c0_i32 = arith.constant 0 : i32
    %c0_i32_0 = arith.constant 0 : i32
    %c0_i32_1 = arith.constant 0 : i32
    return %arg0, %c0_i32, %c0_i32_0 : i32, i32, i32
  }
}

</mosaic_0001>

<bundles_post_ra>
// kernel: tpu_custom_call.1
= control target key start
LH: loop header
LB: loop body
LE: loop exit
PB: predicated region body
PF: predicated region fallthrough
CT: control target
= control target key end

     0   :  { %7 = vsyncpa [#allocation4], 0  ;;  %vm60_vm0 = vcmask 130048   ;;  %v622_v0 = vmov 0.0   ;;  %s1308_s0 = inlined_call_operand.vmem [shape: f32[128,16], index: 0, kind: input, shape index: {}]   ;;  %s1309_s1 = inlined_call_operand.vmem [shape: f32[128,16], index: 1, kind: input, shape index: {}]   ;;  %s1310_s2 = inlined_call_operand.hbm [shape: f32[1,1,1], index: 2, kind: output, shape index: {}]  }
   0x1   :  { %61 = vst.msk [vmem:[#allocation2] sm:$0xff] %vm60_vm0, %v622_v0  ;;  %v62_v1 = vld [vmem:[%s1308_s0] sm:$0xff]  ;;  %v63_v2 = vld [vmem:[%s1308_s0 + $0x8] sm:$0xff]  ;;  %v64_v3 = vld [vmem:[%s1308_s0 + $0x10] sm:$0xff]  ;;  %s506_s19 = sshll.u32 %s1310_s2, 4  ;;  %s507_s19 = int_to_ptr.hbm [resolvable:$true] %s506_s19 }
   0x2   :  { %v65_v4 = vld [vmem:[%s1308_s0 + $0x18] sm:$0xff]  ;;  %v66_v5 = vld [vmem:[%s1308_s0 + $0x20] sm:$0xff]  ;;  %v67_v6 = vld [vmem:[%s1308_s0 + $0x28] sm:$0xff]  ;;  %532 = vlog2.f32 %v62_v1  ;;  %v681_v13 = vsub.f32 0.0, %v62_v1  ;;  %v683_v14 = vsub.f32 0.0, %v63_v2  ;;  %v695_v17 = vsub.f32 0.0, %v64_v3 }
   0x3   :  { %v68_v7 = vld [vmem:[%s1308_s0 + $0x30] sm:$0xff]  ;;  %v69_v8 = vld [vmem:[%s1308_s0 + $0x38] sm:$0xff]  ;;  %v70_v9 = vld [vmem:[%s1308_s0 + $0x40] sm:$0xff]  ;;  %534 = vlog2.f32 %v63_v2  ;;  %v697_v18 = vsub.f32 0.0, %v65_v4  ;;  %v699_v19 = vsub.f32 0.0, %v66_v5  ;;  %v711_v22 = vsub.f32 0.0, %v67_v6 }
   0x4   :  { %v71_v10 = vld [vmem:[%s1308_s0 + $0x48] sm:$0xff]  ;;  %v674_v11 = vld [vmem:[%s1308_s0 + $0x50] sm:$0xff]  ;;  %v679_v12 = vld [vmem:[%s1309_s1] sm:$0xff]  ;;  %536 = vlog2.f32 %v64_v3  ;;  %v713_v23 = vsub.f32 0.0, %v68_v7  ;;  %v715_v24 = vsub.f32 0.0, %v69_v8  ;;  %v723_v27 = vsub.f32 0.0, %v70_v9 }
   0x5   :  { %v688_v15 = vld [vmem:[%s1308_s0 + $0x58] sm:$0xff]  ;;  %v693_v16 = vld [vmem:[%s1309_s1 + $0x8] sm:$0xff]  ;;  %v704_v20 = vld [vmem:[%s1308_s0 + $0x60] sm:$0xff]  ;;  %538 = vlog2.f32 %v65_v4  ;;  %v94_v26 = vmul.f32 0.8, %v679_v12  ;;  %v725_v28 = vsub.f32 0.0, %v71_v10 }
   0x6   :  { %v709_v21 = vld [vmem:[%s1309_s1 + $0x10] sm:$0xff]  ;;  %v720_v25 = vld [vmem:[%s1309_s1 + $0x18] sm:$0xff]  ;;  %v728_v29 = vsub.f32 0.0, %v674_v11  ;;  %v733_v30 = vld [vmem:[%s1309_s1 + $0x20] sm:$0xff]  ;;  %v95_v33 = vmul.f32 0.8, %v693_v16  ;;  %540 = vlog2.f32 %v66_v5 }
   0x7   :  { %v738_v31 = vld [vmem:[%s1309_s1 + $0x28] sm:$0xff]  ;;  %v743_v32 = vld [vmem:[%s1309_s1 + $0x30] sm:$0xff]  ;;  %v747_v34 = vsub.f32 0.0, %v688_v15  ;;  %v754_v36 = vld [vmem:[%s1309_s1 + $0x38] sm:$0xff]  ;;  %v96_v39 = vmul.f32 0.8, %v709_v21  ;;  %542 = vlog2.f32 %v67_v6 }
   0x8   :  { %v749_v35 = vpop.eup %532  ;;  %v759_v37 = vld [vmem:[%s1309_s1 + $0x40] sm:$0xff]  ;;  %v764_v38 = vld [vmem:[%s1309_s1 + $0x48] sm:$0xff]  ;;  %v768_v40 = vsub.f32 0.0, %v704_v20  ;;  %v775_v42 = vld [vmem:[%s1309_s1 + $0x50] sm:$0xff]  ;;  %v97_v45 = vmul.f32 0.8, %v720_v25  ;;  %544 = vlog2.f32 %v68_v7 }
   0x9   :  { %v770_v41 = vpop.eup %534  ;;  %v780_v43 = vld [vmem:[%s1309_s1 + $0x58] sm:$0xff]  ;;  %v785_v44 = vld [vmem:[%s1309_s1 + $0x60] sm:$0xff]  ;;  %vm126_vm1 = vcmp.eq.f32.partialorder %v679_v12, 0.0  ;;  %v794_v47 = vld [vmem:[%s1309_s1 + $0x68] sm:$0xff]  ;;  %v98_v50 = vmul.f32 0.8, %v733_v30  ;;  %546 = vlog2.f32 %v69_v8 }
   0xa   :  { %1325 = vst [vmem:[#allocation6_spill] sm:$0xff] %v780_v43  ;;  %v789_v46 = vpop.eup %536  ;;  %v799_v48 = vld [vmem:[%s1309_s1 + $0x70] sm:$0xff]  ;;  %v804_v49 = vld [vmem:[%s1309_s1 + $0x78] sm:$0xff]  ;;  %vm127_vm2 = vcmp.eq.f32.partialorder %v693_v16, 0.0  ;;  %vm128_vm3 = vcmp.eq.f32.partialorder %v709_v21, 0.0  ;;  %vm129_vm4 = vcmp.eq.f32.partialorder %v720_v25, 0.0  ;;  %548 = vlog2.f32 %v70_v9 }
   0xb   :  { %1326 = vst [vmem:[#allocation7_spill] sm:$0xff] %v785_v44  ;;  %vm130_vm5 = vcmp.eq.f32.partialorder %v733_v30, 0.0  ;;  %v811_v51 = vpop.eup %538  ;;  %v99_v52 = vmul.f32 0.8, %v738_v31  ;;  %v100_v53 = vmul.f32 0.8, %v743_v32  ;;  %550 = vlog2.f32 %v71_v10 }
   0xc   :  { %1327 = vst [vmem:[#allocation8_spill] sm:$0xff] %v794_v47  ;;  %v101_v54 = vmul.f32 0.8, %v754_v36  ;;  %v102_v55 = vmul.f32 0.8, %v759_v37  ;;  %v541_v58 = vpop.eup %540  ;;  %v822_v59 = vld [vmem:[%s1308_s0 + $0x68] sm:$0xff]  ;;  %552 = vlog2.f32 %v674_v11 }
   0xd   :  { %1328 = vst [vmem:[#allocation9_spill] sm:$0xff] %v799_v48  ;;  %v103_v56 = vmul.f32 0.8, %v764_v38  ;;  %v104_v57 = vmul.f32 0.8, %v775_v42  ;;  %v543_v63 = vpop.eup %542  ;;  %v831_v0 = vld [vmem:[%s1308_s0 + $0x70] sm:$0xff]  ;;  %554 = vlog2.f32 %v688_v15 }
   0xe   :  { %1329 = vst [vmem:[#allocation10_spill] sm:$0xff] %v804_v49  ;;  %v105_v60 = vmul.f32 0.8, %v780_v43  ;;  %v106_v61 = vmul.f32 0.8, %v785_v44  ;;  %v545_v4 = vpop.eup %544  ;;  %v841_v5 = vld [vmem:[%s1308_s0 + $0x78] sm:$0xff]  ;;  %556 = vlog2.f32 %v704_v20 }
   0xf   :  { %v107_v62 = vmul.f32 0.8, %v794_v47  ;;  %v108_v1 = vmul.f32 0.8, %v799_v48  ;;  %v109_v2 = vmul.f32 0.8, %v804_v49  ;;  %v547_v9 = vpop.eup %546  ;;  %558 = vlog2.f32 %v822_v59 }
  0x10   :  { %v835_v3 = vadd.f32 0.1, %v94_v26  ;;  %v843_v6 = vadd.f32 0.1, %v95_v33  ;;  %v845_v7 = vadd.f32 0.1, %v96_v39  ;;  %v549_v26 = vpop.eup %548  ;;  %560 = vlog2.f32 %v831_v0 }
  0x11   :  { %v847_v8 = vadd.f32 0.1, %v97_v45  ;;  %v850_v10 = vadd.f32 0.1, %v98_v50  ;;  %v852_v11 = vadd.f32 0.1, %v99_v52  ;;  %v551_v45 = vpop.eup %550  ;;  %562 = vlog2.f32 %v841_v5 }
  0x12   :  { %v854_v15 = vadd.f32 0.1, %v100_v53  ;;  %v857_v49 = vadd.f32 0.1, %v101_v54  ;;  %v859_v33 = vadd.f32 0.1, %v102_v55  ;;  %v553_v53 = vpop.eup %552 }
  0x13   :  { %v861_v39 = vadd.f32 0.1, %v103_v56  ;;  %v864_v20 = vadd.f32 0.1, %v104_v57  ;;  %v866_v50 = vadd.f32 0.1, %v105_v60  ;;  %v555_v54 = vpop.eup %554 }
  0x14   :  { %1330 = vst [vmem:[#allocation11_spill] sm:$0xff] %v857_v49  ;;  %v868_v52 = vadd.f32 0.1, %v106_v61  ;;  %v871_v48 = vadd.f32 0.1, %v107_v62  ;;  %vm131_vm6 = vcmp.eq.f32.partialorder %v738_v31, 0.0  ;;  %v557_v61 = vpop.eup %556 }
  0x15   :  { %1331 = vst [vmem:[#allocation12_spill] sm:$0xff] %v859_v33  ;;  %vm132_vm7 = vcmp.eq.f32.partialorder %v743_v32, 0.0  ;;  %vm133_vm8 = vcmp.eq.f32.partialorder %v754_v36, 0.0  ;;  %v876_v55 = vadd.f32 0.1, %v108_v1  ;;  %vm134_vm9 = vcmp.eq.f32.partialorder %v759_v37, 0.0  ;;  %v559_v62 = vpop.eup %558 }
  0x16   :  { %1332 = vst [vmem:[#allocation13_spill] sm:$0xff] %v861_v39  ;;  %v878_v56 = vadd.f32 0.1, %v109_v2  ;;  %v1316_v57 = vmov -1.0   ;;  %v916_v2 = vmul.f32 0.6931472, %v749_v35  ;;  %v561_v25 = vpop.eup %560 }
  0x17   :  { %1333 = vst [vmem:[#allocation14_spill] sm:$0xff] %v864_v20  ;;  %v884_v60 = vsel %vm126_vm1, -0.5, %v1316_v57  ;;  %v889_v31 = vsel %vm127_vm2, -0.5, %v1316_v57  ;;  %v894_v32 = vsel %vm128_vm3, -0.5, %v1316_v57  ;;  %v899_v36 = vsel %vm129_vm4, -0.5, %v1316_v57  ;;  %v563_v47 = vpop.eup %562  ;;  %s624_s0 = smov [#allocation3]  }
  0x18   :  { %1334 = vst [vmem:[#allocation15_spill] sm:$0xff] %v866_v50  ;;  %v904_v12 = vsel %vm130_vm5, -0.5, %v1316_v57  ;;  %v907_v16 = vsel %vm131_vm6, -0.5, %v1316_v57  ;;  %v910_v1 = vsel %vm132_vm7, -0.5, %v1316_v57  ;;  %v913_v21 = vsel %vm133_vm8, -0.5, %v1316_v57  ;;  %s504_s16 = sshll.u32 %s624_s0, 4  ;;  %s505_s16 = int_to_ptr.vmem [resolvable:$true] %s504_s16 }
  0x19   :  { %1335 = vst [vmem:[#allocation16_spill] sm:$0xff] %v868_v52  ;;  %v922_v30 = vmul.f32 0.6931472, %v789_v46  ;;  %v929_v44 = vmul.f32 0.6931472, %v543_v63  ;;  %v243_v50 = vmul.f32 -0.5, %v695_v17 }
  0x1a   :  { %1336 = vst [vmem:[#allocation17_spill] sm:$0xff] %v871_v48  ;;  %v927_v48 = vmul.f32 0.6931472, %v541_v58  ;;  %v931_v57 = vmul.f32 0.6931472, %v545_v4  ;;  %v252_v37 = vmul.f32 -0.5, %v697_v18 }
  0x1b   :  { %1337 = vst [vmem:[#allocation18_spill] sm:$0xff] %v876_v55  ;;  %v925_v55 = vmul.f32 0.6931472, %v811_v51  ;;  %v933_v52 = vmul.f32 0.6931472, %v547_v9  ;;  %v1348_v51 = vmov -1.0  }
  0x1c   :  { %1338 = vst [vmem:[#allocation19_spill] sm:$0xff] %v878_v56  ;;  %v919_v56 = vmul.f32 0.6931472, %v770_v41  ;;  %v935_v35 = vmul.f32 0.6931472, %v549_v26  ;;  %v948_v58 = vsel %vm134_vm9, -0.5, %v1348_v51 }
  0x1d   :  { %1339 = vst [vmem:[#allocation20_spill] sm:$0xff] %v899_v36  ;;  %v937_v43 = vmul.f32 0.6931472, %v551_v45  ;;  %v939_v41 = vmul.f32 0.6931472, %v553_v53  ;;  %v222_v9 = vadd.f32 1.0, %v681_v13 }
  0x1e   :  { %1340 = vst [vmem:[#allocation21_spill] sm:$0xff] %v904_v12  ;;  %v941_v46 = vmul.f32 0.6931472, %v555_v54  ;;  %v950_v63 = vmul.f32 0.6931472, %v559_v62  ;;  %v231_v62 = vadd.f32 1.0, %v683_v14 }
  0x1f   :  { %1341 = vst [vmem:[#allocation22_spill] sm:$0xff] %v907_v16  ;;  %v952_v4 = vmul.f32 0.6931472, %v561_v25  ;;  %v955_v26 = vmul.f32 0.6931472, %v563_v47  ;;  %v225_v45 = vmul.f32 -0.5, %v681_v13  ;;  %564 = vlog2.f32 %v222_v9 }
  0x20   :  { %1342 = vst [vmem:[#allocation23_spill] sm:$0xff] %v910_v1  ;;  %v228_v54 = vand.u32 2147483647, %v681_v13  ;;  %v249_v25 = vadd.f32 1.0, %v697_v18  ;;  %566 = vlog2.f32 %v231_v62  ;;  %v979_v9 = vsub.f32 0.0, %v822_v59 }
  0x21   :  { %1343 = vst [vmem:[#allocation24_spill] sm:$0xff] %v913_v21  ;;  %v943_v21 = vmul.f32 0.6931472, %v557_v61  ;;  %v240_v61 = vadd.f32 1.0, %v695_v17  ;;  %v226_v53 = vadd.f32 1.0, %v225_v45  ;;  %v984_v20 = vsub.f32 0.0, %v831_v0 }
  0x22   :  { %1344 = vst [vmem:[#allocation25_spill] sm:$0xff] %v937_v43  ;;  %v237_v1 = vand.u32 2147483647, %v683_v14  ;;  %vm986_vm10 = vcmp.lt.f32.partialorder %v228_v54, 0.0004427343  ;;  %v258_v47 = vadd.f32 1.0, %v699_v19 }
  0x23   :  { %1345 = vst [vmem:[#allocation26_spill] sm:$0xff] %v939_v41  ;;  %568 = vlog2.f32 %v240_v61  ;;  %v244_v62 = vadd.f32 1.0, %v243_v50  ;;  %v267_v59 = vadd.f32 1.0, %v711_v22  ;;  %v993_v51 = vsub.f32 0.0, %v841_v5 }
  0x24   :  { %1346 = vst [vmem:[#allocation27_spill] sm:$0xff] %v941_v46  ;;  %570 = vlog2.f32 %v249_v25  ;;  %v255_v0 = vand.u32 2147483647, %v697_v18  ;;  %v261_v54 = vmul.f32 -0.5, %v699_v19  ;;  %vm1001_vm11 = vcmp.lt.f32.partialorder %v237_v1, 0.0004427343 }
  0x25   :  { %1347 = vst [vmem:[#allocation28_spill] sm:$0xff] %v943_v21  ;;  %v565_v45 = vpop.eup %564  ;;  %v999_v21 = vmul.f32 %v226_v53, %v681_v13  ;;  %v253_v50 = vadd.f32 1.0, %v252_v37  ;;  %572 = vlog2.f32 %v258_v47  ;;  %v264_v5 = vand.u32 2147483647, %v699_v19 }
  0x26   :  { %1349 = vst [vmem:[#allocation29_spill] sm:$0xff] %v948_v58  ;;  %v234_v58 = vmul.f32 -0.5, %v683_v14  ;;  %v567_v25 = vpop.eup %566  ;;  %v270_v16 = vmul.f32 -0.5, %v711_v22  ;;  %v285_v39 = vadd.f32 1.0, %v715_v24  ;;  %v1009_v46 = vmul.f32 0.6931472, %v565_v45 }
  0x27   :  { %1350 = vst [vmem:[#allocation30_spill] sm:$0xff] %v950_v63  ;;  %v246_v63 = vand.u32 2147483647, %v695_v17  ;;  %v1015_v1 = vmul.f32 %v244_v62, %v695_v17  ;;  %574 = vlog2.f32 %v267_v59  ;;  %vm1021_vm13 = vcmp.lt.f32.partialorder %v255_v0, 0.0004427343 }
  0x28   :  { %1351 = vst [vmem:[#allocation31_spill] sm:$0xff] %v952_v4  ;;  %v262_v12 = vadd.f32 1.0, %v261_v54  ;;  %v294_v45 = vadd.f32 1.0, %v723_v27  ;;  %v1026_v41 = vmul.f32 0.6931472, %v567_v25  ;;  %v279_v17 = vmul.f32 -0.5, %v713_v23 }
  0x29   :  { %1352 = vst [vmem:[#allocation32_spill] sm:$0xff] %v955_v26  ;;  %v235_v26 = vadd.f32 1.0, %v234_v58  ;;  %v276_v58 = vadd.f32 1.0, %v713_v23  ;;  %v569_v53 = vpop.eup %568  ;;  %vm1017_vm12 = vcmp.lt.f32.partialorder %v246_v63, 0.0004427343  ;;  %v303_v54 = vadd.f32 1.0, %v725_v28 }
  0x2a   :  { %v571_v33 = vpop.eup %570  ;;  %vm1032_vm14 = vcmp.lt.f32.partialorder %v264_v5, 0.0004427343  ;;  %v273_v62 = vand.u32 2147483647, %v711_v22  ;;  %v1041_v0 = vmul.f32 0.6931472, %v569_v53  ;;  %v1048_v25 = vmul.f32 %v262_v12, %v699_v19 }
  0x2b   :  { %v1012_v13 = vmul.f32 %v235_v26, %v683_v14  ;;  %v1029_v14 = vmul.f32 %v253_v50, %v697_v18  ;;  %576 = vlog2.f32 %v276_v58  ;;  %v271_v26 = vadd.f32 1.0, %v270_v16  ;;  %v573_v50 = vpop.eup %572 }
  0x2c   :  { %578 = vlog2.f32 %v285_v39  ;;  %v288_v18 = vmul.f32 -0.5, %v715_v24  ;;  %v1045_v58 = vmul.f32 0.6931472, %v571_v33  ;;  %v282_v16 = vand.u32 2147483647, %v713_v23 }
  0x2d   :  { %580 = vlog2.f32 %v294_v45  ;;  %v575_v39 = vpop.eup %574  ;;  %v239_v5 = vsel %vm1001_vm11, %v1012_v13, %v1026_v41  ;;  %v280_v53 = vadd.f32 1.0, %v279_v17  ;;  %v291_v59 = vand.u32 2147483647, %v715_v24 }
  0x2e   :  { %v297_v36 = vmul.f32 -0.5, %v723_v27  ;;  %v1058_v33 = vmul.f32 %v271_v26, %v711_v22  ;;  %vm1060_vm15 = vcmp.lt.f32.partialorder %v273_v62, 0.0004427343  ;;  %v306_v12 = vmul.f32 -0.5, %v725_v28 }
  0x2f   :  { %v312_v45 = vadd.f32 1.0, %v728_v29  ;;  %v248_v41 = vsel %vm1017_vm12, %v1015_v1, %v1041_v0  ;;  %v1070_v61 = vmul.f32 0.6931472, %v573_v50  ;;  %v289_v13 = vadd.f32 1.0, %v288_v18 }
  0x30   :  { %582 = vlog2.f32 %v303_v54  ;;  %v257_v17 = vsel %vm1021_vm13, %v1029_v14, %v1045_v58  ;;  %v1076_v26 = vmul.f32 0.6931472, %v575_v39  ;;  %vm1078_vm1 = vcmp.lt.f32.partialorder %v282_v16, 0.0004427343 }
  0x31   :  { %v577_v49 = vpop.eup %576  ;;  %v315_v43 = vmul.f32 -0.5, %v728_v29  ;;  %v1084_v1 = vmul.f32 %v280_v53, %v713_v23  ;;  %vm1086_vm2 = vcmp.lt.f32.partialorder %v291_v59, 0.0004427343  ;;  %v298_v0 = vadd.f32 1.0, %v297_v36 }
  0x32   :  { %v579_v22 = vpop.eup %578  ;;  %v300_v18 = vand.u32 2147483647, %v723_v27  ;;  %v1091_v14 = vmul.f32 0.6931472, %v577_v49  ;;  %v307_v54 = vadd.f32 1.0, %v306_v12  ;;  %584 = vlog2.f32 %v312_v45 }
  0x33   :  { %v581_v47 = vpop.eup %580  ;;  %v309_v50 = vand.u32 2147483647, %v725_v28  ;;  %v1094_v58 = vmul.f32 0.6931472, %v579_v22  ;;  %v1097_v16 = vmul.f32 %v289_v13, %v715_v24  ;;  %v321_v23 = vadd.f32 1.0, %v747_v34 }
  0x34   :  { %v324_v59 = vmul.f32 -0.5, %v747_v34  ;;  %v266_v36 = vsel %vm1032_vm14, %v1048_v25, %v1070_v61  ;;  %v275_v49 = vsel %vm1060_vm15, %v1058_v33, %v1076_v26  ;;  %v316_v39 = vadd.f32 1.0, %v315_v43 }
  0x35   :  { %v318_v53 = vand.u32 2147483647, %v728_v29  ;;  %v1110_v24 = vmul.f32 0.6931472, %v581_v47  ;;  %v1113_v45 = vmul.f32 %v298_v0, %v723_v27  ;;  %vm1115_vm3 = vcmp.lt.f32.partialorder %v300_v18, 0.0004427343 }
  0x36   :  { %v583_v12 = vpop.eup %582  ;;  %v327_v63 = vand.u32 2147483647, %v747_v34  ;;  %v284_v25 = vsel %vm1078_vm1, %v1084_v1, %v1091_v14  ;;  %v1125_v43 = vmul.f32 %v307_v54, %v725_v28  ;;  %vm1127_vm4 = vcmp.lt.f32.partialorder %v309_v50, 0.0004427343 }
  0x37   :  { %v330_v27 = vadd.f32 1.0, %v768_v40  ;;  %v293_v19 = vsel %vm1086_vm2, %v1097_v16, %v1094_v58  ;;  %586 = vlog2.f32 %v321_v23  ;;  %v325_v61 = vadd.f32 1.0, %v324_v59 }
  0x38   :  { %v333_v22 = vmul.f32 -0.5, %v768_v40  ;;  %v585_v26 = vpop.eup %584  ;;  %v1137_v62 = vmul.f32 0.6931472, %v583_v12  ;;  %v1140_v28 = vmul.f32 %v316_v39, %v728_v29  ;;  %vm1142_vm5 = vcmp.lt.f32.partialorder %v318_v53, 0.0004427343 }
  0x39   :  { %v336_v0 = vand.u32 2147483647, %v768_v40  ;;  %v302_v37 = vsel %vm1115_vm3, %v1113_v45, %v1110_v24  ;;  %vm1151_vm6 = vcmp.lt.f32.partialorder %v327_v63, 0.0004427343  ;;  %v339_v47 = vadd.f32 1.0, %v979_v9 }
  0x3a   :  { %v1377_v29 = vsel %vm986_vm10, %v999_v21, %v1009_v46  ;;  %588 = vlog2.f32 %v330_v27  ;;  %v348_v54 = vadd.f32 1.0, %v984_v20  ;;  %v367_v50 = vmax.f32 %v239_v5, -100.0 }
  0x3b   :  { %v366_v14 = vmax.f32 %v1377_v29, -100.0  ;;  %v368_v58 = vmax.f32 %v248_v41, -100.0  ;;  %v314_v16 = vmul.f32 0.6931472, %v585_v26  ;;  %v1163_v23 = vmul.f32 %v325_v61, %v747_v34 }
  0x3c   :  { %v334_v59 = vadd.f32 1.0, %v333_v22  ;;  %v342_v39 = vmul.f32 -0.5, %v979_v9  ;;  %v311_v4 = vsel %vm1127_vm4, %v1125_v43, %v1137_v62  ;;  %vm1170_vm7 = vcmp.lt.f32.partialorder %v336_v0, 0.0004427343 }
  0x3d   :  { %v345_v46 = vand.u32 2147483647, %v979_v9  ;;  %v369_v5 = vmax.f32 %v257_v17, -100.0  ;;  %v587_v41 = vpop.eup %586  ;;  %590 = vlog2.f32 %v339_v47  ;;  %v351_v34 = vmul.f32 -0.5, %v984_v20 }
  0x3e   :  { %v357_v53 = vadd.f32 1.0, %v993_v51  ;;  %v1380_v12 = vmax.f32 %v916_v2, -100.0  ;;  %592 = vlog2.f32 %v348_v54  ;;  %v370_v45 = vmax.f32 %v266_v36, -100.0 }
  0x3f   :  { %v1381_v13 = vmax.f32 %v919_v56, -100.0  ;;  %v1382_v43 = vmax.f32 %v922_v30, -100.0  ;;  %v320_v17 = vsel %vm1142_vm5, %v1140_v28, %v314_v16  ;;  %v335_v27 = vmul.f32 %v334_v59, %v768_v40 }
  0x40   :  { %v382_v24 = vsub.f32 %v1380_v12, %v366_v14  ;;  %v343_v61 = vadd.f32 1.0, %v342_v39  ;;  %v354_v22 = vand.u32 2147483647, %v984_v20  ;;  %v589_v26 = vpop.eup %588  ;;  %v323_v2 = vmul.f32 0.6931472, %v587_v41 }
  0x41   :  { %v383_v63 = vsub.f32 %v1381_v13, %v367_v50  ;;  %v384_v33 = vsub.f32 %v1382_v43, %v368_v58  ;;  %vm1188_vm8 = vcmp.lt.f32.partialorder %v345_v46, 0.0004427343  ;;  %v371_v56 = vmax.f32 %v275_v49, -100.0 }
  0x42   :  { %v1385_v36 = vmax.f32 %v925_v55, -100.0  ;;  %v352_v0 = vadd.f32 1.0, %v351_v34  ;;  %594 = vlog2.f32 %v357_v53  ;;  %v360_v1 = vmul.f32 -0.5, %v993_v51 }
  0x43   :  { %v398_v28 = vmul.f32 %v382_v24, %v835_v3  ;;  %v372_v40 = vmax.f32 %v284_v25, -100.0  ;;  %v1386_v47 = vmax.f32 %v927_v48, -100.0  ;;  %v399_v54 = vmul.f32 %v383_v63, %v843_v6  ;;  %v591_v59 = vpop.eup %590 }
  0x44   :  { %v385_v30 = vsub.f32 %v1385_v36, %v369_v5  ;;  %v400_v16 = vmul.f32 %v384_v33, %v845_v7  ;;  %v332_v39 = vmul.f32 0.6931472, %v589_v26  ;;  %v344_v49 = vmul.f32 %v343_v61, %v979_v9  ;;  %v593_v41 = vpop.eup %592  ;;  %v1397_v36 = vld [vmem:[#allocation11_spill] sm:$0xff] }
  0x45   :  { %v386_v29 = vsub.f32 %v1386_v47, %v370_v45  ;;  %vm1201_vm9 = vcmp.lt.f32.partialorder %v354_v22, 0.0004427343  ;;  %v363_v46 = vand.u32 2147483647, %v993_v51  ;;  %v329_v48 = vsel %vm1151_vm6, %v1163_v23, %v323_v2 }
  0x46   :  { %v373_v3 = vmax.f32 %v293_v19, -100.0  ;;  %v1389_v6 = vmax.f32 %v929_v44, -100.0  ;;  %v401_v7 = vmul.f32 %v385_v30, %v847_v8  ;;  %v353_v34 = vmul.f32 %v352_v0, %v984_v20  ;;  %v1398_v30 = vld [vmem:[#allocation20_spill] sm:$0xff] }
  0x47   :  { %v361_v9 = vadd.f32 1.0, %v360_v1  ;;  %v374_v53 = vmax.f32 %v302_v37, -100.0  ;;  %v414_v12 = vadd.f32 %v398_v28, %v366_v14  ;;  %v1390_v24 = vmax.f32 %v931_v57, -100.0  ;;  %v1401_v28 = vld [vmem:[#allocation12_spill] sm:$0xff] }
  0x48   :  { %v387_v25 = vsub.f32 %v1389_v6, %v371_v56  ;;  %v402_v63 = vmul.f32 %v386_v29, %v850_v10  ;;  %v415_v43 = vadd.f32 %v399_v54, %v367_v50  ;;  %v416_v33 = vadd.f32 %v400_v16, %v368_v58  ;;  %v595_v18 = vpop.eup %594  ;;  %v1402_v16 = vld [vmem:[#allocation21_spill] sm:$0xff] }
  0x49   :  { %v388_v13 = vsub.f32 %v1390_v24, %v372_v40  ;;  %v338_v19 = vsel %vm1170_vm7, %v335_v27, %v332_v39  ;;  %v341_v44 = vmul.f32 0.6931472, %v591_v59  ;;  %v350_v23 = vmul.f32 0.6931472, %v593_v41  ;;  %v1407_v24 = vld [vmem:[#allocation31_spill] sm:$0xff] }
  0x4a   :  { %vm1218_vm10 = vcmp.lt.f32.partialorder %v363_v46, 0.0004427343  ;;  %v375_v20 = vmax.f32 %v311_v4, -100.0  ;;  %v1393_v37 = vmax.f32 %v933_v52, -100.0  ;;  %v403_v57 = vmul.f32 %v387_v25, %v852_v11  ;;  %v1403_v46 = vld [vmem:[#allocation27_spill] sm:$0xff]  ;;  %v1405_v25 = vld [vmem:[#allocation13_spill] sm:$0xff] }
  0x4b   :  { %v417_v61 = vadd.f32 %v401_v7, %v369_v5  ;;  %v362_v10 = vmul.f32 %v361_v9, %v993_v51  ;;  %v376_v50 = vmax.f32 %v320_v17, -100.0  ;;  %v1394_v58 = vmax.f32 %v935_v35, -100.0  ;;  %v1406_v9 = vld [vmem:[#allocation22_spill] sm:$0xff] }
  0x4c   :  { %v389_v14 = vsub.f32 %v1393_v37, %v373_v3  ;;  %v430_v27 = vmul.f32 %v414_v12, %v884_v60  ;;  %vm135_vm11 = vcmp.eq.f32.partialorder %v764_v38, 0.0  ;;  %v404_v22 = vmul.f32 %v388_v13, %v854_v15  ;;  %v1395_v60 = vld [vmem:[#allocation25_spill] sm:$0xff]  ;;  %v1411_v37 = vld [vmem:[#allocation23_spill] sm:$0xff] }
  0x4d   :  { %v390_v21 = vsub.f32 %v1394_v58, %v374_v53  ;;  %v418_v26 = vadd.f32 %v402_v63, %v370_v45  ;;  %v431_v4 = vmul.f32 %v415_v43, %v889_v31  ;;  %v432_v52 = vmul.f32 %v416_v33, %v894_v32  ;;  %v1399_v32 = vld [vmem:[#allocation26_spill] sm:$0xff]  ;;  %v1408_v43 = vld [vmem:[#allocation28_spill] sm:$0xff] }
  0x4e   :  { %v347_v11 = vsel %vm1188_vm8, %v344_v49, %v341_v44  ;;  %v356_v51 = vsel %vm1201_vm9, %v353_v34, %v350_v23  ;;  %v359_v5 = vmul.f32 0.6931472, %v595_v18  ;;  %v377_v35 = vmax.f32 %v329_v48, -100.0  ;;  %v1410_v44 = vld [vmem:[#allocation14_spill] sm:$0xff] }
  0x4f   :  { %vm136_vm12 = vcmp.eq.f32.partialorder %v775_v42, 0.0  ;;  %v1396_v17 = vmax.f32 %v1395_v60, -100.0  ;;  %v405_v15 = vmul.f32 %v389_v14, %v1397_v36  ;;  %v419_v45 = vadd.f32 %v403_v57, %v371_v56  ;;  %v1413_v58 = vld [vmem:[#allocation30_spill] sm:$0xff] }
  0x50   :  { %v433_v31 = vmul.f32 %v417_v61, %v1398_v30  ;;  %v378_v0 = vmax.f32 %v338_v19, -100.0  ;;  %v1400_v1 = vmax.f32 %v1399_v32, -100.0  ;;  %v406_v47 = vmul.f32 %v390_v21, %v1401_v28  ;;  %v1412_v61 = vld [vmem:[#allocation32_spill] sm:$0xff]  ;;  %v1417_v60 = vld [vmem:[#allocation6_spill] sm:$0xff] }
  0x51   :  { %v391_v2 = vsub.f32 %v1396_v17, %v375_v20  ;;  %v448_v29 = vsel %vm60_vm0, %v430_v27, 0.0  ;;  %v420_v54 = vadd.f32 %v404_v22, %v372_v40  ;;  %v434_v59 = vmul.f32 %v418_v26, %v1402_v16  ;;  %v1415_v26 = vld [vmem:[#allocation15_spill] sm:$0xff] }
  0x52   :  { %v392_v62 = vsub.f32 %v1400_v1, %v376_v50  ;;  %v449_v39 = vsel %vm60_vm0, %v431_v4, 0.0  ;;  %v451_v49 = vsel %vm60_vm0, %v432_v52, 0.0  ;;  %v365_v56 = vsel %vm1218_vm10, %v362_v10, %v359_v5 }
  0x53   :  { %v379_v55 = vmax.f32 %v347_v11, -100.0  ;;  %v1404_v41 = vmax.f32 %v1403_v46, -100.0  ;;  %v450_v6 = vadd.f32 %v449_v39, %v448_v29  ;;  %v407_v7 = vmul.f32 %v391_v2, %v1405_v25  ;;  %v1416_v11 = vld [vmem:[#allocation24_spill] sm:$0xff]  ;;  %v1422_v29 = vld [vmem:[#allocation17_spill] sm:$0xff] }
  0x54   :  { %v421_v34 = vadd.f32 %v405_v15, %v373_v3  ;;  %v435_v12 = vmul.f32 %v419_v45, %v1406_v9  ;;  %v453_v40 = vsel %vm60_vm0, %v433_v31, 0.0  ;;  %v204_v13 = vmax.f32 %v1407_v24, -100.0  ;;  %v1419_v15 = vld [vmem:[#allocation16_spill] sm:$0xff]  ;;  %v1420_v31 = vld [vmem:[#allocation29_spill] sm:$0xff] }
  0x55   :  { %v393_v48 = vsub.f32 %v1404_v41, %v377_v35  ;;  %v380_v63 = vmax.f32 %v356_v51, -100.0  ;;  %v1409_v33 = vmax.f32 %v1408_v43, -100.0  ;;  %v452_v19 = vadd.f32 %v451_v49, %v450_v6  ;;  %v1423_v39 = vld [vmem:[#allocation8_spill] sm:$0xff]  ;;  %v1425_v6 = vld [vmem:[#allocation9_spill] sm:$0xff] }
  0x56   :  { %v408_v23 = vmul.f32 %v392_v62, %v1410_v44  ;;  %v422_v8 = vadd.f32 %v406_v47, %v374_v53  ;;  %v436_v14 = vmul.f32 %v420_v54, %v1411_v37  ;;  %v455_v57 = vsel %vm60_vm0, %v434_v59, 0.0 }
  0x57   :  { %v394_v18 = vsub.f32 %v1409_v33, %v378_v0  ;;  %v205_v3 = vmax.f32 %v1412_v61, -100.0  ;;  %v381_v10 = vmax.f32 %v365_v56, -100.0  ;;  %v1414_v21 = vmax.f32 %v1413_v58, -100.0  ;;  %v1424_v56 = vld [vmem:[#allocation18_spill] sm:$0xff] }
  0x58   :  { %v454_v22 = vadd.f32 %v453_v40, %v452_v19  ;;  %v409_v4 = vmul.f32 %v393_v48, %v1415_v26  ;;  %v423_v52 = vadd.f32 %v407_v7, %v375_v20  ;;  %v437_v51 = vmul.f32 %v421_v34, %v1416_v11  ;;  %v1421_v20 = vld [vmem:[#allocation7_spill] sm:$0xff] }
  0x59   :  { %v395_v27 = vsub.f32 %v1414_v21, %v379_v55  ;;  %v457_v5 = vsel %vm60_vm0, %v435_v12, 0.0  ;;  %vm137_vm13 = vcmp.eq.f32.partialorder %v1417_v60, 0.0  ;;  %v1418_v53 = vmov -1.0   ;;  %v1426_v7 = vld [vmem:[#allocation19_spill] sm:$0xff] }
  0x5a   :  { %v151_v17 = vsel %vm135_vm11, -0.5, %v1418_v53  ;;  %v396_v2 = vsub.f32 %v204_v13, %v380_v63  ;;  %v456_v36 = vadd.f32 %v455_v57, %v454_v22  ;;  %v410_v45 = vmul.f32 %v394_v18, %v1419_v15 }
  0x5b   :  { %v424_v30 = vadd.f32 %v408_v23, %v376_v50  ;;  %v438_v32 = vmul.f32 %v422_v8, %v1420_v31  ;;  %v459_v1 = vsel %vm60_vm0, %v436_v14, 0.0  ;;  %vm138_vm14 = vcmp.eq.f32.partialorder %v1421_v20, 0.0 }
  0x5c   :  { %v152_v62 = vsel %vm136_vm12, -0.5, %v1418_v53  ;;  %v397_v28 = vsub.f32 %v205_v3, %v381_v10  ;;  %v458_v47 = vadd.f32 %v457_v5, %v456_v36  ;;  %v411_v38 = vmul.f32 %v395_v27, %v1422_v29 }
  0x5d   :  { %v425_v54 = vadd.f32 %v409_v4, %v377_v35  ;;  %v439_v16 = vmul.f32 %v423_v52, %v151_v17  ;;  %v461_v59 = vsel %vm60_vm0, %v437_v51, 0.0  ;;  %vm139_vm15 = vcmp.eq.f32.partialorder %v1423_v39, 0.0  ;;  %v446_v4 = vld [vmem:[#allocation2] sm:$0xff] }
  0x5e   :  { %v153_v50 = vsel %vm137_vm13, -0.5, %v1418_v53  ;;  %v460_v49 = vadd.f32 %v459_v1, %v458_v47  ;;  %v412_v46 = vmul.f32 %v396_v2, %v1424_v56  ;;  %v426_v41 = vadd.f32 %v410_v45, %v378_v0  ;;  %v1427_v0 = vld [vmem:[#allocation10_spill] sm:$0xff] }
  0x5f   :  { %v440_v42 = vmul.f32 %v424_v30, %v152_v62  ;;  %v463_v48 = vsel %vm60_vm0, %v438_v32, 0.0  ;;  %vm140_vm1 = vcmp.eq.f32.partialorder %v1425_v6, 0.0  ;;  %v154_v35 = vsel %vm138_vm14, -0.5, %v1418_v53 }
  0x60   :  { %v462_v25 = vadd.f32 %v461_v59, %v460_v49  ;;  %v413_v34 = vmul.f32 %v397_v28, %v1426_v7  ;;  %v427_v9 = vadd.f32 %v411_v38, %v379_v55  ;;  %v441_v12 = vmul.f32 %v425_v54, %v153_v50 }
  0x61   :  { %v465_v40 = vsel %vm60_vm0, %v439_v16, 0.0  ;;  %v155_v24 = vsel %vm139_vm15, -0.5, %v1418_v53  ;;  %vm141_vm2 = vcmp.eq.f32.partialorder %v1427_v0, 0.0  ;;  %v428_v43 = vadd.f32 %v412_v46, %v380_v63 }
  0x62   :  { %v464_v13 = vadd.f32 %v463_v48, %v462_v25  ;;  %v442_v33 = vmul.f32 %v426_v41, %v154_v35  ;;  %v467_v18 = vsel %vm60_vm0, %v440_v42, 0.0  ;;  %v156_v19 = vsel %vm140_vm1, -0.5, %v1418_v53 }
  0x63   :  { %v429_v23 = vadd.f32 %v413_v34, %v381_v10  ;;  %v443_v8 = vmul.f32 %v427_v9, %v155_v24  ;;  %v469_v37 = vsel %vm60_vm0, %v441_v12, 0.0  ;;  %v157_v55 = vsel %vm141_vm2, -0.5, %v1418_v53 }
  0x64   :  { %v466_v44 = vadd.f32 %v465_v40, %v464_v13  ;;  %v444_v57 = vmul.f32 %v428_v43, %v156_v19  ;;  %v471_v61 = vsel %vm60_vm0, %v442_v33, 0.0  ;;  %vm497_vm3 = vcmask 0  }
  0x65   :  { %v445_v58 = vmul.f32 %v429_v23, %v157_v55  ;;  %v473_v63 = vsel %vm60_vm0, %v443_v8, 0.0 }
  0x66   :  { %v468_v14 = vadd.f32 %v467_v18, %v466_v44  ;;  %v475_v27 = vsel %vm60_vm0, %v444_v57, 0.0 }
  0x67   :  { %v477_v26 = vsel %vm60_vm0, %v445_v58, 0.0 }
  0x68   :  { %v470_v3 = vadd.f32 %v469_v37, %v468_v14 }
  0x6a   :  { %v472_v21 = vadd.f32 %v471_v61, %v470_v3 }
  0x6c   :  { %v474_v22 = vadd.f32 %v473_v63, %v472_v21 }
  0x6e   :  { %v476_v10 = vadd.f32 %v475_v27, %v474_v22 }
  0x70   :  { %v478_v52 = vadd.f32 %v477_v26, %v476_v10 }
  0x72   :  { %v479_v11 = vadd.f32 %v478_v52, %v446_v4 }
  0x74   :  { %480 = vst.msk [vmem:[#allocation2] sm:$0xff] %vm60_vm0, %v479_v11 }
  0x7b   :  { %v484_v51 = vld [vmem:[#allocation2] sm:$0xff] }
  0x7c   :  { %v485_v5 = vsel %vm60_vm0, %v484_v51, 0.0 }
  0x7d   :  { %486 = vadd.xlane.f32.xlu0 %v485_v5 }
  0xf0   :  { %v487_v60 = vpop.xlane.xlu0 %486 }
  0xf1   :  { %v488_v53 = vrot.slane %v487_v60, 4 }
  0xf3   :  { %v489_v17 = vadd.f32 %v488_v53, %v487_v60 }
  0xf5   :  { %v490_v2 = vrot.slane %v489_v17, 2 }
  0xf7   :  { %v491_v36 = vadd.f32 %v490_v2, %v489_v17 }
  0xf9   :  { %v492_v15 = vrot.slane %v491_v36, 1 }
  0xfb   :  { %v493_v45 = vadd.f32 %v492_v15, %v491_v36 }
  0xfd   :  { %527 = vpush %v493_v45 }
 0x12e   :  { %s528_s20 = spop %527 }
 0x12f   :  { %s495_s21 = smul.f32 0.00048828125, %s528_s20 }
 0x131   :  { %v496_v30 = vstv %s495_s21 }
 0x132   :  { %498 = vst.msk [vmem:[#allocation3] sm:$0x1] %vm497_vm3, %v496_v30 }
 0x133   :  { %509 = dma.vmem_to_hbm [thread:$0]  %s505_s16, 16, %s507_s19, [#allocation4]  }
 0x134   :  { %620 = dma.done.wait [#allocation4], 16  }
 0x135   :  { %621 = vsyncadd [#allocation4], 4294967280 }
 0x136   :  { %514 = vsyncpa [#allocation4], 1 }

</bundles_post_ra>
